<compile_context>
chip_gen: v6e
topology: v6e:2x2x1
jax: 0.10.0
libtpu: 0.0.40
codegen_flags: <defaults>
</compile_context>

<pallas_src>
import jax
import jax.numpy as jnp
from jax.experimental import pallas as pl
from jax.experimental.pallas import tpu as pltpu


# ---------------------------------------------------------------------------
# Hardware-aware sizing helpers
# ---------------------------------------------------------------------------

def _physical_vmem_bytes():
    try:
        return int(pltpu.get_tpu_info().vmem_capacity_bytes)
    except Exception:
        return 64 * 1024 * 1024  # conservative: v7x per-TensorCore VMEM


def _block_budget_bytes(phys):
    # Budget for block buffers (double-buffered in/out at native dtype) plus
    # ~2 block-sized f32 temporaries inside the kernel; keep >half of VMEM as
    # headroom for compiler internals on every generation.
    return max(8 * 1024 * 1024, int(phys * 0.40))


def _largest_row_tile(n, tf, per_elem, budget):
    """Largest row tile tn (multiple of 8, dividing n) whose block fits budget."""
    if n % 8 != 0:
        return None
    max_tn = (budget // (tf * per_elem)) // 8 * 8
    if max_tn < 8:
        max_tn = 8
    tn = min(max_tn, n)
    tn -= tn % 8
    while tn >= 8 and n % tn != 0:
        tn -= 8
    return tn if tn >= 8 else None


def _plan(n, f, itemsize):
    """Pick (path, lane_tile, row_tile) for a [n, f] log-softmax over dim 0."""
    phys = _physical_vmem_bytes()
    budget = _block_budget_bytes(phys)
    # Per block element: 2x-buffered input + 2x-buffered output at native
    # dtype, plus ~2 block-sized f32 temporaries inside the kernel.
    per_elem = 4 * itemsize + 8

    if f % 128 == 0:
        tf_candidates = [t for t in (512, 256, 128) if f % t == 0] or [f]
    else:
        tf_candidates = [f]  # tiny / ragged F: last block dim = full extent

    # Preferred: full reduction axis resident per block (single fused kernel).
    for tf in tf_candidates:
        if n * tf * per_elem <= budget:
            # v7x megacore: prefer >=2 grid points along the parallel F axis.
            while f // tf == 1 and tf > 128 and tf % 2 == 0 and f % (tf // 2) == 0:
                tf //= 2
            return ("fused", tf, n)

    # Whole reduction axis does not fit: tile N with an online cross-block
    # max/sum-exp reduction (two HBM read passes + one write).
    tf = tf_candidates[-1]
    tn = _largest_row_tile(n, tf, per_elem, budget)
    if tn is not None:
        return ("two_pass", tf, tn)
    # TODO(synk): N not a multiple of 8 and too large for one block -- would
    # need masked ragged row tiles; fall back to a single oversized block.
    return ("fused", tf, n)


# ---------------------------------------------------------------------------
# Kernels
# ---------------------------------------------------------------------------

def _log_softmax_dim0_fused_kernel(x_ref, o_ref):
    """Full reduction (dim 0) axis resident in the block.

    Two reads of x_ref: pass 1 computes lse, pass 2 re-reads x for the store,
    so the f32 copy / exp temporary are not held live across the write.
    VMEM re-reads are cheap (3 vld slots per cycle).
    """
    x = x_ref[...].astype(jnp.float32)              # f32 math (stable; v5e has no bf16 VPU/EUP)
    m = jnp.max(x, axis=0, keepdims=True)
    lse = m + jnp.log(jnp.sum(jnp.exp(x - m), axis=0, keepdims=True))
    o_ref[...] = (x_ref[...].astype(jnp.float32) - lse).astype(o_ref.dtype)


def _lse_dim0_kernel(x_ref, lse_ref, m_sc, l_sc):
    """Online (cross-block) max / sum-exp over dim 0; writes lse on last step."""
    ni = pl.program_id(1)

    @pl.when(ni == 0)
    def _():
        m_sc[...] = jnp.full_like(m_sc, -jnp.inf)
        l_sc[...] = jnp.zeros_like(l_sc)

    x = x_ref[...].astype(jnp.float32)
    m_new = jnp.maximum(m_sc[...], jnp.max(x, axis=0, keepdims=True))
    l_sc[...] = l_sc[...] * jnp.exp(m_sc[...] - m_new) + jnp.sum(
        jnp.exp(x - m_new), axis=0, keepdims=True)
    m_sc[...] = m_new

    @pl.when(ni == pl.num_programs(1) - 1)
    def _():
        lse_ref[...] = m_sc[...] + jnp.log(l_sc[...])


def _sub_lse_kernel(x_ref, lse_ref, o_ref):
    o_ref[...] = (x_ref[...].astype(jnp.float32) - lse_ref[...]).astype(o_ref.dtype)


# ---------------------------------------------------------------------------
# pallas_call wrappers
# ---------------------------------------------------------------------------

def _log_softmax_dim0_fused(x, tf, vmem_limit):
    n, f = x.shape
    return pl.pallas_call(
        _log_softmax_dim0_fused_kernel,
        out_shape=jax.ShapeDtypeStruct(x.shape, x.dtype),
        grid=(f // tf,),
        in_specs=[pl.BlockSpec((n, tf), lambda j: (0, j))],
        out_specs=pl.BlockSpec((n, tf), lambda j: (0, j)),
        compiler_params=pltpu.CompilerParams(
            # F axis is embarrassingly parallel: shards across v7x's 2 TCs
            # (no-op on single-TC v5e/v6e).
            dimension_semantics=("parallel",),
            vmem_limit_bytes=vmem_limit),
    )(x)


def _log_softmax_dim0_two_pass(x, tf, tn, vmem_limit):
    n, f = x.shape
    grid = (f // tf, n // tn)
    lse = pl.pallas_call(
        _lse_dim0_kernel,
        out_shape=jax.ShapeDtypeStruct((1, f), jnp.float32),
        grid=grid,
        in_specs=[pl.BlockSpec((tn, tf), lambda j, i: (i, j))],
        out_specs=pl.BlockSpec((1, tf), lambda j, i: (0, j)),
        scratch_shapes=[pltpu.VMEM((1, tf), jnp.float32),
                        pltpu.VMEM((1, tf), jnp.float32)],
        compiler_params=pltpu.CompilerParams(
            dimension_semantics=("parallel", "arbitrary"),
            vmem_limit_bytes=vmem_limit),
    )(x)
    return pl.pallas_call(
        _sub_lse_kernel,
        out_shape=jax.ShapeDtypeStruct(x.shape, x.dtype),
        grid=grid,
        in_specs=[pl.BlockSpec((tn, tf), lambda j, i: (i, j)),
                  pl.BlockSpec((1, tf), lambda j, i: (0, j))],
        out_specs=pl.BlockSpec((tn, tf), lambda j, i: (i, j)),
        compiler_params=pltpu.CompilerParams(
            dimension_semantics=("parallel", "parallel"),
            vmem_limit_bytes=vmem_limit),
    )(x, lse)


def net_forward(x):
    """Equivalent of Net.forward: log_softmax over dim 0 of a [N, F] tensor."""
    n, f = x.shape
    kind, tf, tn = _plan(n, f, jnp.dtype(x.dtype).itemsize)
    vmem_limit = int(_physical_vmem_bytes() * 0.7)
    if kind == "fused":
        return _log_softmax_dim0_fused(x, tf, vmem_limit)
    return _log_softmax_dim0_two_pass(x, tf, tn, vmem_limit)


def init_params(key):
    # Deterministic init of the (unused) Linear(2, 5) parameters, mirroring the
    # PyTorch module's __init__; forward never applies them.
    kw, kb = jax.random.split(key)
    w = jax.random.normal(kw, (5, 2), dtype=jnp.float32) * 0.1
    b = jax.random.normal(kb, (5,), dtype=jnp.float32) * 0.1
    return {"layer1_w": w, "layer1_b": b}


if __name__ == "__main__":
    key = jax.random.PRNGKey(0)
    k_x, k_x2, k_x3, k_p = jax.random.split(key, 4)

    _params = init_params(k_p)  # unused by forward, mirrors __init__

    # 1) Real workload shape implied by the module: [N, 2] (Linear in_features=2).
    #    Single unblocked pallas_call on the original layout (no transposes).
    x = jax.random.normal(k_x, (8, 2), dtype=jnp.float32)
    out = jax.block_until_ready(net_forward(x))
    ref = jax.nn.log_softmax(x, axis=0)
    assert out.shape == x.shape
    assert jnp.allclose(out, ref, atol=1e-5, rtol=1e-5), "mismatch (tiny-F path)"

    # 2) Lane-dense F: fused path, grid over F (>=2 points for v7x megacore).
    x2 = jax.random.normal(k_x2, (8, 256), dtype=jnp.float32)
    out2 = jax.block_until_ready(net_forward(x2))
    ref2 = jax.nn.log_softmax(x2, axis=0)
    assert out2.shape == x2.shape
    assert jnp.allclose(out2, ref2, atol=1e-5, rtol=1e-5), "mismatch (fused tiled path)"

    # 3) Exercise the huge-N fallback (online cross-block reduction) at a small
    #    forced tiling so the path is compile/run verified.
    x3 = jax.random.normal(k_x3, (16, 256), dtype=jnp.float32)
    out3 = jax.block_until_ready(
        _log_softmax_dim0_two_pass(x3, tf=128, tn=8,
                                   vmem_limit=int(_physical_vmem_bytes() * 0.7)))
    ref3 = jax.nn.log_softmax(x3, axis=0)
    assert out3.shape == x3.shape
    assert jnp.allclose(out3, ref3, atol=1e-5, rtol=1e-5), "mismatch (two-pass path)"

    print("KERNEL_OK")
</pallas_src>

<mosaic_0001>
module attributes {stable_mosaic.version = 11 : i64} {
  func.func @_log_softmax_dim0_fused_kernel(%arg0: i32, %arg1: memref<8x2xf32, #tpu.memory_space<vmem>>, %arg2: memref<8x2xf32, #tpu.memory_space<vmem>>) attributes {dimension_semantics = [#tpu.dimension_semantics<parallel>], iteration_bounds = array<i64: 1>, scalar_prefetch = 0 : i64, scratch_operands = 0 : i64, tpu.core_type = #tpu.core_type<tc>, window_params = [{transform_indices = @transform_0, window_bounds = array<i64: 8, 2>}, {transform_indices = @transform_1, window_bounds = array<i64: 8, 2>}]} {
    %c0 = arith.constant 0 : index
    %c0_0 = arith.constant 0 : index
    %0 = vector.load %arg1[%c0, %c0_0] : memref<8x2xf32, #tpu.memory_space<vmem>>, vector<8x2xf32>
    %cst = arith.constant dense<0xFF800000> : vector<2xf32>
    %1 = vector.multi_reduction <maximumf>, %0, %cst [0] : vector<8x2xf32> to vector<2xf32>
    %2 = vector.shape_cast %1 : vector<2xf32> to vector<1x2xf32>
    %3 = vector.broadcast %2 : vector<1x2xf32> to vector<8x2xf32>
    %4 = arith.subf %0, %3 : vector<8x2xf32>
    %5 = math.exp %4 : vector<8x2xf32>
    %cst_1 = arith.constant dense<0.000000e+00> : vector<2xf32>
    %6 = vector.multi_reduction <add>, %5, %cst_1 [0] : vector<8x2xf32> to vector<2xf32>
    %7 = vector.shape_cast %6 : vector<2xf32> to vector<1x2xf32>
    %8 = math.log %7 : vector<1x2xf32>
    %9 = arith.addf %2, %8 : vector<1x2xf32>
    %c0_2 = arith.constant 0 : index
    %c0_3 = arith.constant 0 : index
    %10 = vector.load %arg1[%c0_2, %c0_3] : memref<8x2xf32, #tpu.memory_space<vmem>>, vector<8x2xf32>
    %11 = vector.broadcast %9 : vector<1x2xf32> to vector<8x2xf32>
    %12 = arith.subf %10, %11 : vector<8x2xf32>
    %c0_4 = arith.constant 0 : index
    %c0_5 = arith.constant 0 : index
    %13 = vector.load %arg2[%c0_4, %c0_5] : memref<8x2xf32, #tpu.memory_space<vmem>>, vector<8x2xf32>
    tpu.vector_store %arg2[%c0_4, %c0_5], %12 {strides = array<i32>} : memref<8x2xf32, #tpu.memory_space<vmem>>, vector<8x2xf32>,
    return
  }
  func.func @transform_0(%arg0: i32) -> (i32, i32) {
    %c0_i32 = arith.constant 0 : i32
    %c0_i32_0 = arith.constant 0 : i32
    return %c0_i32, %arg0 : i32, i32
  }
  func.func @transform_1(%arg0: i32) -> (i32, i32) {
    %c0_i32 = arith.constant 0 : i32
    %c0_i32_0 = arith.constant 0 : i32
    return %c0_i32, %arg0 : i32, i32
  }
}

</mosaic_0001>

<bundles_post_ra>
// kernel: tpu_custom_call.1
= control target key start
LH: loop header
LB: loop body
LE: loop exit
PB: predicated region body
PF: predicated region fallthrough
CT: control target
= control target key end

     0   :  { %vm9_vm0 = vcmask 15360   ;;  %s59_s0 = inlined_call_operand.vmem [shape: f32[8,2], index: 0, kind: input, shape index: {}]   ;;  %s60_s1 = inlined_call_operand.vmem [shape: f32[8,2], index: 1, kind: output, shape index: {}]  }
   0x1   :  { %v8_v0 = vld [vmem:[%s59_s0] sm:$0xff] }
   0x2   :  { %v10_v1 = vsel %vm9_vm0, %v8_v0, -inf }
   0x3   :  { %v11_v2 = vrot.slane %v10_v1, 4 }
   0x5   :  { %v12_v3 = vmax.f32 %v10_v1, %v11_v2 }
   0x7   :  { %v13_v4 = vrot.slane %v12_v3, 2 }
   0x9   :  { %v14_v5 = vmax.f32 %v12_v3, %v13_v4 }
   0xb   :  { %v15_v6 = vrot.slane %v14_v5, 1 }
   0xd   :  { %v16_v7 = vmax.f32 %v14_v5, %v15_v6 }
   0xf   :  { %v17_v8 = vsub.f32 %v8_v0, %v16_v7 }
  0x11   :  { %v18_v9 = vmul.f32 1.442695, %v17_v8 }
  0x13   :  { %36 = vpow2.f32 %v18_v9 }
  0x20   :  { %v37_v10 = vpop.eup %36 }
  0x21   :  { %v20_v11 = vsel %vm9_vm0, %v37_v10, 0.0 }
  0x22   :  { %v21_v12 = vrot.slane %v20_v11, 4 }
  0x24   :  { %v22_v13 = vadd.f32 %v21_v12, %v20_v11 }
  0x26   :  { %v23_v14 = vrot.slane %v22_v13, 2 }
  0x28   :  { %v24_v15 = vadd.f32 %v23_v14, %v22_v13 }
  0x2a   :  { %v25_v16 = vrot.slane %v24_v15, 1 }
  0x2c   :  { %v26_v17 = vadd.f32 %v25_v16, %v24_v15 }
  0x2e   :  { %38 = vlog2.f32 %v26_v17 }
  0x3b   :  { %v39_v18 = vpop.eup %38 }
  0x3c   :  { %v28_v19 = vmul.f32 0.6931472, %v39_v18 }
  0x3e   :  { %v29_v20 = vadd.f32 %v28_v19, %v16_v7 }
  0x40   :  { %v30_v21 = vsub.f32 %v8_v0, %v29_v20 }
  0x42   :  { %31 = vst.msk [vmem:[%s60_s1] sm:$0xff] %vm9_vm0, %v30_v21 }

</bundles_post_ra>
